<compile_context>
chip_gen: v7x
topology: tpu7x:2x2x1
jax: 0.10.0
libtpu: 0.0.40
codegen_flags: <defaults>
</compile_context>

<pallas_src>
import jax
import jax.numpy as jnp
from jax.experimental import pallas as pl
from jax.experimental.pallas import tpu as pltpu


def res_layer_kernel(x_ref, w1_ref, b1_ref, w2_ref, b2_ref, o_ref):
    # Read x once: f32 copy for the residual add, bf16 copy for the MXU.
    x_f32 = x_ref[...]
    x_bf16 = x_f32.astype(jnp.bfloat16)

    # y = relu(x @ W1 + b1)   (bf16 operands, f32 accumulate)
    y = jnp.dot(x_bf16, w1_ref[...], preferred_element_type=jnp.float32)
    y = jnp.maximum(y + b1_ref[...], 0.0)

    # dropout (eval mode) -> identity

    # y = relu(y @ W2 + b2)
    y = jnp.dot(y.astype(jnp.bfloat16), w2_ref[...],
                preferred_element_type=jnp.float32)
    y = jnp.maximum(y + b2_ref[...], 0.0)

    # residual add in f32
    o_ref[...] = (x_f32 + y).astype(o_ref.dtype)


def _pick_tb(B, cap=256):
    """Largest sublane-aligned (multiple of 8) divisor of B that is <= cap,
    preferring a choice that yields >= 2 grid steps (v7x has 2 TensorCores)."""
    candidates = [t for t in range(8, min(B, cap) + 1, 8) if B % t == 0]
    if not candidates:
        return B  # tiny / unaligned batch: one full-array tile (still legal)
    multi = [t for t in candidates if B // t >= 2]
    return max(multi) if multi else max(candidates)


def res_layer(x, w1, b1, w2, b2, *, tb=None):
    """x: (B, D) float32.  w1/w2: (D, D), already laid out so y = x @ w.
    b1/b2: (1, D) float32.  Weights are cast to bf16 for the MXU."""
    B, D = x.shape
    if tb is None:
        tb = _pick_tb(B)
    assert B % tb == 0

    # bf16 weights: native MXU dtype, half the DMA bytes / resident VMEM.
    w1_bf16 = w1.astype(jnp.bfloat16)
    w2_bf16 = w2.astype(jnp.bfloat16)

    # VMEM budget (conservative: assume double-buffering of everything):
    weight_bytes = 2 * (2 * D * D * 2)      # two bf16 weights, 2 buffers each
    bias_bytes = 2 * (2 * D * 4)            # two f32 biases, 2 buffers each
    io_bytes = 2 * (2 * tb * D * 4)         # f32 x tile + out tile, 2 buffers
    needed = weight_bytes + bias_bytes + io_bytes + (16 << 20)  # + headroom
    vmem_limit = int(min(max(needed, 32 << 20), 64 << 20))

    cost = pl.CostEstimate(
        flops=4 * B * D * D,                 # two (B,D) x (D,D) matmuls
        transcendentals=0,
        bytes_accessed=2 * B * D * 4 + 2 * D * D * 2 + 2 * D * 4,
    )

    grid = (B // tb,)
    return pl.pallas_call(
        res_layer_kernel,
        out_shape=jax.ShapeDtypeStruct((B, D), x.dtype),
        grid_spec=pltpu.PrefetchScalarGridSpec(
            num_scalar_prefetch=0,
            grid=grid,
            in_specs=[
                pl.BlockSpec((tb, D), lambda i: (i, 0)),   # x tile
                pl.BlockSpec((D, D), lambda i: (0, 0)),    # W1 (resident)
                pl.BlockSpec((1, D), lambda i: (0, 0)),    # b1
                pl.BlockSpec((D, D), lambda i: (0, 0)),    # W2 (resident)
                pl.BlockSpec((1, D), lambda i: (0, 0)),    # b2
            ],
            out_specs=pl.BlockSpec((tb, D), lambda i: (i, 0)),
        ),
        compiler_params=pltpu.CompilerParams(
            dimension_semantics=("parallel",),
            vmem_limit_bytes=vmem_limit),
        cost_estimate=cost,
    )(x, w1_bf16, b1, w2_bf16, b2)


def reference_f32(x, w1, b1, w2, b2):
    y = jnp.maximum(x @ w1 + b1, 0.0)
    y = jnp.maximum(y @ w2 + b2, 0.0)
    return x + y


if __name__ == "__main__":
    B, D = 64, 128  # linear_size = 128 (lane-dense); B=64 -> tb=32, 2 grid steps

    key = jax.random.PRNGKey(0)
    kx, k1, k2, k3, k4 = jax.random.split(key, 5)

    # Deterministic parameter init (PyTorch Linear-style uniform bounds).
    bound = 1.0 / jnp.sqrt(D)
    x = jax.random.normal(kx, (B, D), dtype=jnp.float32)
    # PyTorch stores weight as (out, in); build that then transpose for x @ W.
    w1_pt = jax.random.uniform(k1, (D, D), minval=-bound, maxval=bound,
                               dtype=jnp.float32)
    b1 = jax.random.uniform(k2, (1, D), minval=-bound, maxval=bound,
                            dtype=jnp.float32)
    w2_pt = jax.random.uniform(k3, (D, D), minval=-bound, maxval=bound,
                               dtype=jnp.float32)
    b2 = jax.random.uniform(k4, (1, D), minval=-bound, maxval=bound,
                            dtype=jnp.float32)
    w1 = w1_pt.T
    w2 = w2_pt.T

    out = res_layer(x, w1, b1, w2, b2)
    out = jax.block_until_ready(out)

    ref = reference_f32(x, w1, b1, w2, b2)
    assert out.shape == (B, D)
    # bf16 matmul operands (f32 accumulate) -> loosened tolerance vs f32 ref.
    assert jnp.allclose(out, ref, atol=2e-2, rtol=2e-2)

    print("KERNEL_OK")
</pallas_src>

<mosaic_0001>
module attributes {stable_mosaic.version = 11 : i64} {
  func.func @res_layer_kernel(%arg0: i32, %arg1: memref<32x128xf32, #tpu.memory_space<vmem>>, %arg2: memref<128x128xbf16, #tpu.memory_space<vmem>>, %arg3: memref<1x128xf32, #tpu.memory_space<vmem>>, %arg4: memref<128x128xbf16, #tpu.memory_space<vmem>>, %arg5: memref<1x128xf32, #tpu.memory_space<vmem>>, %arg6: memref<32x128xf32, #tpu.memory_space<vmem>>) attributes {dimension_semantics = [#tpu.dimension_semantics<parallel>], iteration_bounds = array<i64: 2>, scalar_prefetch = 0 : i64, scratch_operands = 0 : i64, tpu.core_type = #tpu.core_type<tc>, window_params = [{transform_indices = @transform_0, window_bounds = array<i64: 32, 128>}, {pipeline_mode = #tpu.pipeline_mode<synchronous>, transform_indices = @transform_1, window_bounds = array<i64: 128, 128>}, {pipeline_mode = #tpu.pipeline_mode<synchronous>, transform_indices = @transform_2, window_bounds = array<i64: 1, 128>}, {pipeline_mode = #tpu.pipeline_mode<synchronous>, transform_indices = @transform_3, window_bounds = array<i64: 128, 128>}, {pipeline_mode = #tpu.pipeline_mode<synchronous>, transform_indices = @transform_4, window_bounds = array<i64: 1, 128>}, {transform_indices = @transform_5, window_bounds = array<i64: 32, 128>}]} {
    %c0 = arith.constant 0 : index
    %c0_0 = arith.constant 0 : index
    %0 = vector.load %arg1[%c0, %c0_0] : memref<32x128xf32, #tpu.memory_space<vmem>>, vector<32x128xf32>
    %1 = arith.truncf %0 : vector<32x128xf32> to vector<32x128xbf16>
    %c0_1 = arith.constant 0 : index
    %c0_2 = arith.constant 0 : index
    %2 = vector.load %arg2[%c0_1, %c0_2] : memref<128x128xbf16, #tpu.memory_space<vmem>>, vector<128x128xbf16>
    %cst = arith.constant dense<0.000000e+00> : vector<32x128xf32>
    %3 = tpu.matmul %1, %2, %cst {dimension_numbers = #tpu.dot_dimension_numbers<[1], [0], [0], [1], [0, 0, 1, 1], [], []>} : vector<32x128xbf16>, vector<128x128xbf16>, vector<32x128xf32> -> vector<32x128xf32>
    %c0_3 = arith.constant 0 : index
    %c0_4 = arith.constant 0 : index
    %4 = vector.load %arg3[%c0_3, %c0_4] : memref<1x128xf32, #tpu.memory_space<vmem>>, vector<1x128xf32>
    %5 = vector.broadcast %4 : vector<1x128xf32> to vector<32x128xf32>
    %6 = arith.addf %3, %5 : vector<32x128xf32>
    %cst_5 = arith.constant 0.000000e+00 : f32
    %7 = vector.broadcast %cst_5 : f32 to vector<32x128xf32>
    %8 = arith.maximumf %6, %7 : vector<32x128xf32>
    %9 = arith.truncf %8 : vector<32x128xf32> to vector<32x128xbf16>
    %c0_6 = arith.constant 0 : index
    %c0_7 = arith.constant 0 : index
    %10 = vector.load %arg4[%c0_6, %c0_7] : memref<128x128xbf16, #tpu.memory_space<vmem>>, vector<128x128xbf16>
    %cst_8 = arith.constant dense<0.000000e+00> : vector<32x128xf32>
    %11 = tpu.matmul %9, %10, %cst_8 {dimension_numbers = #tpu.dot_dimension_numbers<[1], [0], [0], [1], [0, 0, 1, 1], [], []>} : vector<32x128xbf16>, vector<128x128xbf16>, vector<32x128xf32> -> vector<32x128xf32>
    %c0_9 = arith.constant 0 : index
    %c0_10 = arith.constant 0 : index
    %12 = vector.load %arg5[%c0_9, %c0_10] : memref<1x128xf32, #tpu.memory_space<vmem>>, vector<1x128xf32>
    %13 = vector.broadcast %12 : vector<1x128xf32> to vector<32x128xf32>
    %14 = arith.addf %11, %13 : vector<32x128xf32>
    %cst_11 = arith.constant 0.000000e+00 : f32
    %15 = vector.broadcast %cst_11 : f32 to vector<32x128xf32>
    %16 = arith.maximumf %14, %15 : vector<32x128xf32>
    %17 = arith.addf %0, %16 : vector<32x128xf32>
    %c0_12 = arith.constant 0 : index
    %c0_13 = arith.constant 0 : index
    %18 = vector.load %arg6[%c0_12, %c0_13] : memref<32x128xf32, #tpu.memory_space<vmem>>, vector<32x128xf32>
    tpu.vector_store %arg6[%c0_12, %c0_13], %17 {strides = array<i32>} : memref<32x128xf32, #tpu.memory_space<vmem>>, vector<32x128xf32>,
    return
  }
  func.func @transform_0(%arg0: i32) -> (i32, i32) {
    %c0_i32 = arith.constant 0 : i32
    %c0_i32_0 = arith.constant 0 : i32
    return %arg0, %c0_i32 : i32, i32
  }
  func.func @transform_1(%arg0: i32) -> (i32, i32) {
    %c0_i32 = arith.constant 0 : i32
    %c0_i32_0 = arith.constant 0 : i32
    %c0_i32_1 = arith.constant 0 : i32
    return %c0_i32, %c0_i32_0 : i32, i32
  }
  func.func @transform_2(%arg0: i32) -> (i32, i32) {
    %c0_i32 = arith.constant 0 : i32
    %c0_i32_0 = arith.constant 0 : i32
    %c0_i32_1 = arith.constant 0 : i32
    return %c0_i32, %c0_i32_0 : i32, i32
  }
  func.func @transform_3(%arg0: i32) -> (i32, i32) {
    %c0_i32 = arith.constant 0 : i32
    %c0_i32_0 = arith.constant 0 : i32
    %c0_i32_1 = arith.constant 0 : i32
    return %c0_i32, %c0_i32_0 : i32, i32
  }
  func.func @transform_4(%arg0: i32) -> (i32, i32) {
    %c0_i32 = arith.constant 0 : i32
    %c0_i32_0 = arith.constant 0 : i32
    %c0_i32_1 = arith.constant 0 : i32
    return %c0_i32, %c0_i32_0 : i32, i32
  }
  func.func @transform_5(%arg0: i32) -> (i32, i32) {
    %c0_i32 = arith.constant 0 : i32
    %c0_i32_0 = arith.constant 0 : i32
    return %arg0, %c0_i32 : i32, i32
  }
}

</mosaic_0001>

<bundles_post_ra>
// kernel: tpu_custom_call.1
= control target key start
LH: loop header
LB: loop body
LE: loop exit
PB: predicated region body
PF: predicated region fallthrough
CT: control target
= control target key end

     0   :  { %10 = vsyncpa [#allocation3], 0  ;;  %s1288_s0 = inlined_call_operand.hbm [shape: f32[64,128], index: 0, kind: input, shape index: {}]   ;;  %s1289_s1 = inlined_call_operand.hbm [shape: bf16[128,128], index: 1, kind: input, shape index: {}]   ;;  %s1290_s2 = inlined_call_operand.vmem [shape: f32[1,128], index: 2, kind: input, shape index: {}]   ;;  %s1291_s3 = inlined_call_operand.hbm [shape: bf16[128,128], index: 3, kind: input, shape index: {}]   ;;  %s1292_s4 = inlined_call_operand.vmem [shape: f32[1,128], index: 4, kind: input, shape index: {}]   ;;  %s1293_s5 = inlined_call_operand.hbm [shape: f32[64,128], index: 5, kind: output, shape index: {}]  }
   0x1   :  { %12 = vsyncpa [#allocation3 + $0x1], 0 }
   0x2   :  { %13 = vsyncpa [#allocation6], 0 }
   0x3   :  { %14 = vsyncpa [#allocation4], 0 }
   0x4   :  { %16 = vsyncpa [#allocation4 + $0x1], 0  ;;  %s1030_s18 = smov 0   ;;  %s1032_s19 = smov 0  }
   0x5   :  { %s1034_s20 = smov 0   ;;  %s1036_s21 = smov 0  }
   0x6 LB: > { %s1051_s22 = sadd.s32 4294967295, %s988_s21   ;;  %s645_s23 = sadd.s32 4294967294, %s988_s21   ;;  %s988_s21 = sphi %s1036_s21, %s1313_s21   ;;  %s984_s20 = sphi %s1034_s20, %s1312_s20   ;;  %s980_s19 = sphi %s1032_s19, %s1311_s19   ;;  %s976_s18 = sphi %s1030_s18, %s1310_s18  }
   0x7   : > { %p42_p0 = scmp.ne.s32.totalorder %s980_s19, %s976_s18  ;;  %p1294_p1 = scmp.eq.s32.totalorder %s1051_s22, 0 }
   0x8   : > { %p156_p3 = scmp.eq.s32.totalorder %s645_s23, 1  ;;  %p646_p5 = scmp.ge.s32.totalorder %s988_s21, 1 }
   0x9   : > { %p1060_p4 = por %p1294_p1, %p42_p0  ;;  %p163_p7 = scmp.lt.s32.totalorder %s988_s21, 3 }
   0xa   : > { %p1065_p6 = por %p156_p3, %p42_p0  ;;  %s990_s27 = smov [#allocation5]  }
   0xb   : > { %s1297_s24 = scalar_select %p1060_p4, 1, 0 }
   0xc   : > { %s1298_s25 = scalar_select %p1065_p6, 1, 0 }
   0xd   : > { %p1070_p8 = pnand %p646_p5, %p163_p7  ;;  %s175_s28 = sshll.u32 %s990_s27, 4  ;;  %s1074_s28 = int_to_ptr.vmem [resolvable:$true] %s175_s28 }
   0xe   : > { %s991_s30 = smov [#allocation7]   ;;  %s832_s9 = scalar_lea.hbm %s1289_s1, 1024 }
   0xf   : > { %p755_p9 = pneg %p1070_p8  ;;  %s191_s6 = sshll.u32 %s991_s30, 4  ;;  %s1085_s6 = int_to_ptr.vmem [resolvable:$true] %s191_s6 }
  0x10   : > { %p833_p12 = scmp.ne.s32.totalorder %s1289_s1, %s832_s9  ;;  %p839_p5 = scmp.lt.u32.totalorder %s832_s9, %s1289_s1 }
  0x11   : > { %p1081_p11 = pnand %p755_p9, %p1294_p1 }
  0x13   : > { %p834_p13 = pneg %p1081_p11 }
  0x15   : > { %p835_p0 = pnand %p834_p13, %p833_p12 }
  0x17   : > { %p836_p3 = pneg %p835_p0 }
  0x19   : > { %p841_p7 = pnand %p839_p5, %p836_p3 }
  0x1b   : > { %844 = shalt.err (!%p841_p7)
}
  0x1c   : > { %s845_s14 = scalar_lea.vmem %s1074_s28, 1024  ;;  %p853_p2 = scmp.lt.s32.totalorder %s1074_s28, %s1074_s28 }
  0x1d   : > { %p846_p9 = scmp.ne.s32.totalorder %s1074_s28, %s845_s14  ;;  %p854_p12 = scmp.lt.s32.totalorder %s845_s14, %s845_s14 }
  0x1f   : > { %p848_p10 = pnand %p846_p9, %p834_p13  ;;  %p855_p0 = por %p854_p12, %p853_p2 }
  0x21   : > { %p849_p1 = pneg %p848_p10 }
  0x23   : > { %p856_p6 = pnand %p855_p0, %p849_p1 }
  0x25   : > { %859 = shalt.err (!%p856_p6)
}
  0x26   : > { %s992_s15 = smov 64   ;;  %s993_s16 = smov 4  }
  0x27   : > { %758 = dma.hbm_to_vmem [thread:$0]  (!%p1081_p11), %s1289_s1, 1024, %s1074_s28, [#allocation6], %s992_s15, %s992_s15, %s993_s16  }
  0x28   : > { %s860_s7 = scalar_lea.hbm %s1291_s3, 1024 }
  0x29   : > { %p861_p2 = scmp.ne.s32.totalorder %s1291_s3, %s860_s7  ;;  %p867_p10 = scmp.lt.u32.totalorder %s860_s7, %s1291_s3 }
  0x2b   : > { %p863_p1 = pnand %p861_p2, %p834_p13 }
  0x2d   : > { %p864_p6 = pneg %p863_p1 }
  0x2f   : > { %p869_p3 = pnand %p867_p10, %p864_p6 }
  0x31   : > { %872 = shalt.err (!%p869_p3)
}
  0x32   : > { %s873_s28 = scalar_lea.vmem %s1085_s6, 1024  ;;  %p881_p12 = scmp.lt.s32.totalorder %s1085_s6, %s1085_s6 }
  0x33   : > { %p874_p5 = scmp.ne.s32.totalorder %s1085_s6, %s873_s28  ;;  %p882_p0 = scmp.lt.s32.totalorder %s873_s28, %s873_s28 }
  0x35   : > { %p876_p7 = pnand %p874_p5, %p834_p13  ;;  %p883_p2 = por %p882_p0, %p881_p12 }
  0x37   : > { %p877_p9 = pneg %p876_p7 }
  0x39   : > { %p884_p1 = pnand %p883_p2, %p877_p9 }
  0x3b   : > { %887 = shalt.err (!%p884_p1)
}
  0x3c   : > { %761 = dma.hbm_to_vmem [thread:$0]  (!%p1081_p11), %s1291_s3, 1024, %s1085_s6, [#allocation6], %s992_s15, %s992_s15, %s993_s16  }
  0x3d   : > { %s1140_s14 = sadd.s32 1, %s988_s21   ;;  %s29_s29 = sadd.s32 1, %s984_s20 }
  0x3e   : > { %s26_s17 = ssub.s32 %s988_s21, %s1140_s14  ;;  %p36_p13 = scmp.ne.s32.totalorder %s984_s20, %s980_s19 }
  0x3f   : > { %p27_p6 = scmp.eq.s32.totalorder %s26_s17, 0  ;;  %p37_p10 = scmp.eq.s32.totalorder %s988_s21, 0 }
  0x40   : > { %p1301_p3 = scmp.eq.s32.totalorder %s1051_s22, 1  ;;  %p772_p7 = scmp.lt.s32.totalorder %s988_s21, 2 }
  0x41   : > { %s1156_s27 = scalar_select %p27_p6, %s984_s20, %s29_s29  }
  0x42   : > { %p1150_p5 = por %p1301_p3, %p36_p13  ;;  %p38_p9 = por %p37_p10, %p36_p13 }
  0x43   : > { %s208_s30 = sand.u32 1, %s984_s20   ;;  %s681_s6 = sshll.u32 %s988_s21, 9 }
  0x44   : > { %s1302_s23 = scalar_select %p1150_p5, 1, 0 }
  0x45   : > { %s650_s7 = sshll.u32 %s208_s30, 5  ;;  %s1163_s8 = scalar_lea.hbm %s1288_s0, %s681_s6 }
  0x46   : > { %s212_s9 = scalar_lea.vmem [#allocation2], %s650_s7  ;;  %p1167_p11 = pnand %p772_p7, %p38_p9 }
  0x47   : > { %s219_s10 = sshll.u32 %s212_s9, 4  ;;  %s1171_s28 = scalar_lea.sflag [#allocation3], %s208_s30  ;;  %s1165_s10 = int_to_ptr.vmem [resolvable:$true] %s219_s10 }
  0x48   : > { %s888_s12 = scalar_lea.hbm %s1163_s8, 512  ;;  %p890_p0 = pneg %p1167_p11 }
  0x49   : > { %p889_p12 = scmp.ne.s32.totalorder %s1163_s8, %s888_s12  ;;  %s893_s17 = scalar_lea.hbm %s1288_s0, 1024 }
  0x4a   : > { %p894_p13 = scmp.lt.u32.totalorder %s1163_s8, %s1288_s0  ;;  %p895_p6 = scmp.lt.u32.totalorder %s893_s17, %s888_s12 }
  0x4b   : > { %p891_p2 = pnand %p890_p0, %p889_p12  ;;  %p897_p3 = scmp.lt.u32.totalorder %s888_s12, %s1163_s8 }
  0x4c   : > { %p896_p10 = por %p895_p6, %p894_p13 }
  0x4d   : > { %p892_p1 = pneg %p891_p2 }
  0x4e   : > { %p898_p7 = por %p897_p3, %p896_p10 }
  0x50   : > { %p899_p9 = pnand %p898_p7, %p892_p1 }
  0x52   : > { %902 = shalt.err (!%p899_p9)
}
  0x53   : > { %s903_s30 = scalar_lea.vmem %s1165_s10, 512  ;;  %s994_s15 = smov [#allocation2]  }
  0x54   : > { %p904_p12 = scmp.ne.s32.totalorder %s1165_s10, %s903_s30  ;;  %s908_s16 = sshll.u32 %s994_s15, 4  ;;  %s909_s16 = int_to_ptr.vmem [resolvable:$false] %s908_s16 }
  0x55   : > { %s910_s9 = scalar_lea.vmem %s909_s16, 1024  ;;  %p911_p4 = scmp.lt.s32.totalorder %s1165_s10, %s909_s16 }
  0x56   : > { %p906_p2 = pnand %p904_p12, %p890_p0  ;;  %p912_p13 = scmp.lt.s32.totalorder %s910_s9, %s903_s30 }
  0x58   : > { %p907_p5 = pneg %p906_p2  ;;  %p913_p6 = por %p912_p13, %p911_p4 }
  0x5a   : > { %p914_p10 = pnand %p913_p6, %p907_p5 }
  0x5c   : > { %917 = shalt.err (!%p914_p10)
}
  0x5d   : > { %s995_s12 = smov 128   ;;  %s996_s13 = smov 8  }
  0x5e   : > { %765 = dma.hbm_to_vmem [thread:$0]  (!%p1167_p11), %s1163_s8, 512, %s1165_s10, %s1171_s28, %s995_s12, %s995_s12, %s996_s13  }
  0x5f   : > { %231 = sbr.rel (%p1070_p8) target bundleno = 597 (0x255), region = 40  ;;  %s1202_s29 = sand.u32 (!%p1070_p8), 1, %s980_s19  }
  0x60   : > { %s654_s17 = sshll.u32 (!%p1070_p8), %s1202_s29, 5  ;;  %s234_s7 = scalar_lea.sflag (!%p1070_p8), [#allocation3], %s1202_s29 }
  0x61   : > { %s1208_s6 = scalar_lea.vmem (!%p1070_p8), [#allocation2], %s654_s17  ;;  %p1304_p4 = scmp.ne.s32.totalorder (!%p1070_p8), %s1297_s24, 0 }
  0x66   : > { %963 = dma.done.wait (%p1304_p4), %s234_s7, 512  }
  0x67   : > { %965 = vsyncadd (%p1304_p4), %s234_s7, 4294966784  ;;  %p1305_p5 = scmp.eq.s32.totalorder %s1051_s22, 0 }
  0x69   : > { %967 = dma.done.wait (%p1305_p5), [#allocation6], 2048   ;;  %p1306_p8 = pmov %p1305_p5 }
  0x6a   : > { %v816_v0 = vld [vmem:[#allocation5] sm:$0xff]   ;;  %v817_v1 = vld [vmem:[#allocation5 + $0x8] sm:$0xff]   ;;  %v818_v2 = vld [vmem:[#allocation5 + $0x10] sm:$0xff]   ;;  %s271_s11 = scalar_lea.vmem [#allocation8], %s654_s17  ;;  %s682_s30 = sshll.u32 %s1051_s22, 9 }
  0x6b   : > { %969 = vsyncadd (%p1306_p8), [#allocation6], 4294965248  ;;  %703 = vmatprep.subr.bf16.mxu0 %v816_v0  ;;  %v819_v3 = vld [vmem:[#allocation5 + $0x18] sm:$0xff]   ;;  %v1219_v4 = vld [vmem:[%s1208_s6] sm:$0xff]  ;;  %s553_s28 = sshll.u32 %s271_s11, 4  ;;  %s1243_s9 = scalar_lea.hbm %s1293_s5, %s682_s30  ;;  %s1237_s28 = int_to_ptr.vmem [resolvable:$true] %s553_s28 }
  0x6c   : > { %704 = vmatpush3.bf16.msra.mxu0 %v816_v0  ;;  %v1222_v5 = vld [vmem:[%s1208_s6 + $0x8] sm:$0xff]  ;;  %v824_v7 = vld [vmem:[#allocation7] sm:$0xff]   ;;  %v826_v10 = vld [vmem:[#allocation7 + $0x10] sm:$0xff]   ;;  %s540_s22 = scalar_lea.sflag [#allocation4], %s1202_s29  ;;  %s918_s12 = scalar_lea.vmem %s1237_s28, 512 }
  0x6d   : > { %705 = vmatprep.subr.bf16.mxu0 %v817_v1  ;;  %v279_v6 = vpack.c.bf16 %v1222_v5, %v1219_v4  ;;  %v825_v8 = vld [vmem:[#allocation7 + $0x8] sm:$0xff]   ;;  %v820_v9 = vld [vmem:[#allocation5 + $0x20] sm:$0xff]   ;;  %723 = vmatprep.subr.bf16.mxu1 %v824_v7  ;;  %v827_v12 = vld [vmem:[#allocation7 + $0x18] sm:$0xff]   ;;  %p919_p11 = scmp.ne.s32.totalorder %s1237_s28, %s918_s12  ;;  %p1307_p0 = scmp.ne.s32.totalorder %s1302_s23, 0 }
  0x6e   : > { %724 = vmatpush3.bf16.msra.mxu1 %v824_v7  ;;  %v821_v11 = vld [vmem:[#allocation5 + $0x28] sm:$0xff]   ;;  %v822_v13 = vld [vmem:[#allocation5 + $0x30] sm:$0xff]   ;;  %v828_v14 = vld [vmem:[#allocation7 + $0x20] sm:$0xff]   ;;  %s997_s13 = smov [#allocation8]  }
  0x6f   : > { %719 = vmatprep.mubr.bf16.mxu0 %v279_v6  ;;  %725 = vmatprep.subr.bf16.mxu1 %v825_v8  ;;  %v823_v15 = vld [vmem:[#allocation5 + $0x38] sm:$0xff]   ;;  %v829_v16 = vld [vmem:[#allocation7 + $0x28] sm:$0xff]   ;;  %v277_v17 = vld [vmem:[%s1208_s6 + $0x10] sm:$0xff]  ;;  %p920_p1 = pnand %p919_p11, %p1307_p0  ;;  %s922_s17 = sshll.u32 %s997_s13, 4  ;;  %s923_s17 = int_to_ptr.vmem [resolvable:$false] %s922_s17 }
  0x70   : > { %706 = vmatpush3.bf16.msra.mxu0 %v817_v1  ;;  %v278_v18 = vld [vmem:[%s1208_s6 + $0x18] sm:$0xff]  ;;  %v830_v20 = vld [vmem:[#allocation7 + $0x30] sm:$0xff]   ;;  %v658_v22 = vld [vmem:[%s1290_s2] ss:$0 sm:$0xff]  ;;  %s924_s7 = scalar_lea.vmem %s923_s17, 1024  ;;  %p925_p7 = scmp.lt.s32.totalorder %s1237_s28, %s923_s17 }
  0x71   : > { %707 = vmatprep.subr.bf16.mxu0 %v818_v2  ;;  %v280_v19 = vpack.c.bf16 %v278_v18, %v277_v17  ;;  %v831_v21 = vld [vmem:[#allocation7 + $0x38] sm:$0xff]   ;;  %v667_v37 = vld [vmem:[%s1292_s4] ss:$0 sm:$0xff]  ;;  %p921_p3 = pneg %p920_p1  ;;  %p926_p9 = scmp.lt.s32.totalorder %s924_s7, %s918_s12 }
  0x72   : > { %726 = vmatpush3.bf16.msra.mxu1 %v825_v8 }
  0x73   : > { %727 = vmatprep.subr.bf16.mxu1 %v826_v10  ;;  %p927_p12 = por %p926_p9, %p925_p7 }
  0x74   : > { %708 = vmatpush3.bf16.msra.mxu0 %v818_v2 }
  0x75   : > { %709 = vmatprep.subr.bf16.mxu0 %v819_v3  ;;  %p928_p2 = pnand %p927_p12, %p921_p3 }
  0x76   : > { %728 = vmatpush3.bf16.msra.mxu1 %v826_v10 }
  0x77   : > { %729 = vmatprep.subr.bf16.mxu1 %v827_v12 }
  0x78   : > { %710 = vmatpush3.bf16.msra.mxu0 %v819_v3 }
  0x79   : > { %711 = vmatprep.subr.bf16.mxu0 %v820_v9 }
  0x7a   : > { %730 = vmatpush3.bf16.msra.mxu1 %v827_v12 }
  0x7b   : > { %731 = vmatprep.subr.bf16.mxu1 %v828_v14 }
  0x7c   : > { %712 = vmatpush3.bf16.msra.mxu0 %v820_v9 }
  0x7d   : > { %713 = vmatprep.subr.bf16.mxu0 %v821_v11 }
  0x7e   : > { %732 = vmatpush3.bf16.msra.mxu1 %v828_v14 }
  0x7f   : > { %733 = vmatprep.subr.bf16.mxu1 %v829_v16 }
  0x80   : > { %714 = vmatpush3.bf16.msra.mxu0 %v821_v11 }
  0x81   : > { %715 = vmatprep.subr.bf16.mxu0 %v822_v13 }
  0x82   : > { %734 = vmatpush3.bf16.msra.mxu1 %v829_v16 }
  0x83   : > { %735 = vmatprep.subr.bf16.mxu1 %v830_v20 }
  0x84   : > { %716 = vmatpush3.bf16.msra.mxu0 %v822_v13 }
  0x85   : > { %717 = vmatprep.subr.bf16.mxu0 %v823_v15 }
  0x86   : > { %736 = vmatpush3.bf16.msra.mxu1 %v830_v20 }
  0x87   : > { %737 = vmatprep.subr.bf16.mxu1 %v831_v21 }
  0x88   : > { %718 = vmatpush3.bf16.msra.mxu0 %v823_v15 }
  0x8a   : > { %738 = vmatpush3.bf16.msra.mxu1 %v831_v21 }
  0x8b   : > { %720 = vmatmul.mubr.bf16.vlgmr.msra.gmra.mrb[0].mxu0 %v280_v19 }
 0x15e   : > { %v721_v23 = vpop.f32.mrb[0].mxu0 }
 0x15f   : > { %v395_v24 = vadd.f32 %v721_v23, %v658_v22  ;;  %v386_v25 = vpop.f32.mrb[1].mxu0 }
 0x160   : > { %v387_v26 = vadd.f32 %v658_v22, %v386_v25  ;;  %v722_v27 = vpop.f32.mrb[2].mxu0 }
 0x161   : > { %v398_v28 = vadd.f32 %v722_v27, %v658_v22  ;;  %v389_v29 = vpop.f32.mrb[3].mxu0  ;;  %v403_v31 = vmax.f32 %v395_v24, 0.0 }
 0x162   : > { %v390_v30 = vadd.f32 %v658_v22, %v389_v29  ;;  %v401_v33 = vmax.f32 %v387_v26, 0.0 }
 0x163   : > { %v404_v32 = vmax.f32 %v398_v28, 0.0 }
 0x164   : > { %v402_v34 = vmax.f32 %v390_v30, 0.0 }
 0x165   : > { %v406_v35 = vpack.c.bf16 %v404_v32, %v403_v31 }
 0x166   : > { %v405_v36 = vpack.c.bf16 %v402_v34, %v401_v33 }
 0x168   : > { %739 = vmatprep.mubr.bf16.mxu1 %v405_v36 }
 0x169   : > { %740 = vmatmul.mubr.bf16.vlgmr.msra.gmra.mrb[0].mxu1 %v406_v35 }
 0x23c   : > { %v741_v38 = vpop.f32.mrb[0].mxu1 }
 0x23d   : > { %v521_v39 = vadd.f32 %v741_v38, %v667_v37  ;;  %v512_v40 = vpop.f32.mrb[1].mxu1 }
 0x23e   : > { %v513_v41 = vadd.f32 %v667_v37, %v512_v40  ;;  %v742_v42 = vpop.f32.mrb[2].mxu1 }
 0x23f   : > { %v529_v43 = vmax.f32 %v521_v39, 0.0  ;;  %v524_v44 = vadd.f32 %v742_v42, %v667_v37  ;;  %v515_v45 = vpop.f32.mrb[3].mxu1 }
 0x240   : > { %v527_v46 = vmax.f32 %v513_v41, 0.0  ;;  %v516_v47 = vadd.f32 %v667_v37, %v515_v45 }
 0x241   : > { %v533_v48 = vadd.f32 %v529_v43, %v277_v17  ;;  %v530_v49 = vmax.f32 %v524_v44, 0.0 }
 0x242   : > { %v531_v50 = vadd.f32 %v527_v46, %v1219_v4  ;;  %v528_v51 = vmax.f32 %v516_v47, 0.0 }
 0x243   : > { %537 = vst [vmem:[%s271_s11 + $0x10] sm:$0xff] %v533_v48  ;;  %v534_v52 = vadd.f32 %v530_v49, %v278_v18 }
 0x244   : > { %535 = vst [vmem:[%s271_s11] sm:$0xff] %v531_v50  ;;  %v532_v53 = vadd.f32 %v528_v51, %v1222_v5 }
 0x245   : > { %538 = vst [vmem:[%s271_s11 + $0x18] sm:$0xff] %v534_v52 }
 0x246   : > { %536 = vst [vmem:[%s271_s11 + $0x8] sm:$0xff] %v532_v53 }
 0x247   : > { %931 = shalt.err (!%p928_p2)
}
 0x248   : > { %s932_s6 = scalar_lea.hbm %s1243_s9, 512  ;;  %s936_s8 = scalar_lea.hbm %s1293_s5, 1024 }
 0x249   : > { %p933_p13 = scmp.ne.s32.totalorder %s1243_s9, %s932_s6  ;;  %p937_p4 = scmp.lt.u32.totalorder %s1243_s9, %s1293_s5 }
 0x24a   : > { %p938_p5 = scmp.lt.u32.totalorder %s936_s8, %s932_s6  ;;  %p940_p11 = scmp.lt.u32.totalorder %s932_s6, %s1243_s9 }
 0x24b   : > { %p934_p6 = pnand %p933_p13, %p1307_p0 }
 0x24c   : > { %p939_p8 = por %p938_p5, %p937_p4 }
 0x24d   : > { %p935_p10 = pneg %p934_p6 }
 0x24e   : > { %p941_p1 = por %p940_p11, %p939_p8 }
 0x250   : > { %p942_p3 = pnand %p941_p1, %p935_p10 }
 0x252   : > { %945 = shalt.err (!%p942_p3)
}
 0x253   : > { %s998_s30 = smov 128   ;;  %s999_s15 = smov 8  }
 0x254   : > { %753 = dma.vmem_to_hbm [thread:$0]  (%p1307_p0), %s1237_s28, 512, %s1243_s9, %s540_s22, %s998_s30, %s998_s30, %s999_s15  }
 0x255 PF: > { %s568_s16 = sand.u32 1, %s976_s18   ;;  %p1308_p7 = scmp.ne.s32.totalorder %s1298_s25, 0 }
 0x256   : > { %p1309_p9 = scmp.ge.s32.totalorder %s988_s21, 2  ;;  %s569_s12 = scalar_lea.sflag [#allocation4], %s568_s16 }
 0x258   : > { %p767_p12 = pnand %p1309_p9, %p1308_p7 }
 0x25a   : > { %971 = dma.done.wait (!%p767_p12), %s569_s12, 512  }
 0x25b   : > { %973 = vsyncadd (!%p767_p12), %s569_s12, 4294966784  ;;  %p19_p2 = scmp.ge.s32.totalorder %s1140_s14, 4   ;;  %s1310_s18 = smov %s980_s19 }
 0x25c   : > { %s1311_s19 = smov %s984_s20  ;;  %s1312_s20 = smov %s1156_s27 }
 0x25d   : > { %s1313_s21 = smov %s1140_s14  ;;  %21 = sbr.rel (!%p19_p2) target bundleno = 6 (0x6), region = 93 }
 0x264   :  { %574 = vsyncpa [#allocation3], 1 }
 0x265   :  { %576 = vsyncpa [#allocation3 + $0x1], 1 }
 0x266   :  { %577 = vsyncpa [#allocation6], 1 }
 0x267   :  { %578 = vsyncpa [#allocation4], 1 }
 0x268   :  { %580 = vsyncpa [#allocation4 + $0x1], 1 }

</bundles_post_ra>
